<compile_context>
chip_gen: v7x
topology: tpu7x:2x2x1
jax: 0.10.0
libtpu: 0.0.40
codegen_flags: <defaults>
</compile_context>

<pallas_src>
import functools

import jax
import jax.numpy as jnp
from jax import lax
from jax.experimental import pallas as pl
from jax.experimental.pallas import tpu as pltpu

# ----------------------------- HP configuration -----------------------------
F = 8                        # num_features()  (FEATURES_PLAIN)
NUM_TWEAKS = 3
TT = 1 + NUM_TWEAKS          # 4
C = 32                       # CLAUSE_INTERAL_SIZE
EMBEDDER_LAYERS = 2          # CLAUSE_EMBEDDER_LAYERS
N_MID = EMBEDDER_LAYERS - 1  # number of "middle" Linear(C, TT*C) layers

N = 256                      # number of clauses (batch) for the demo

MAX_TILE_N = 1024            # live (C=32, tile_n) f32 intermediate = 32 vregs
MIN_TILE_N = 128


def _pick_tile_n(n):
    """Largest lane tile <= MAX_TILE_N that still leaves >= 2 grid steps
    (so v7x's two TensorCores both get work); never below MIN_TILE_N."""
    half = -(-n // 2)
    half_r = -(-half // 128) * 128
    return max(MIN_TILE_N, min(MAX_TILE_N, half_r))


# ------------------------------- Pallas kernel ------------------------------
def make_kernel(n_mid):
    def kernel(*refs):
        # refs: x, w0, b0, (w_mid, b_mid)*n_mid, w_final_col, out
        x_ref = refs[0]                      # (tile_n, F) f32
        w0_ref, b0_ref = refs[1], refs[2]    # (C, F) bf16, (C, 1) f32
        mid_refs = refs[3:3 + 2 * n_mid]     # (C, C) bf16, (C, 1) f32 pairs
        wf_ref = refs[3 + 2 * n_mid]         # (C, 1) f32
        o_ref = refs[4 + 2 * n_mid]          # (1, tile_n) f32

        # Layer 0 (tweak folded into weights offline): contract the F axis of
        # both operands; result lands clauses-on-lanes (C, tile_n) with f32
        # accumulation.  bf16 operands -> single-pass MXU on all generations.
        x_bf = x_ref[...].astype(jnp.bfloat16)
        h = lax.dot_general(w0_ref[...], x_bf,
                            dimension_numbers=(((1,), (1,)), ((), ())),
                            preferred_element_type=jnp.float32)
        h = jnp.maximum(h + b0_ref[...], 0.0)            # f32 bias/ReLU

        # Middle layers.
        for m in range(n_mid):
            w = mid_refs[2 * m][...]                     # (C, C) bf16
            b = mid_refs[2 * m + 1][...]                 # (C, 1) f32
            h = jnp.dot(w, h.astype(jnp.bfloat16),
                        preferred_element_type=jnp.float32)
            h = jnp.maximum(h + b, 0.0)

        # Key layer (bias-free, tweak folded): VPU multiply + sublane reduce
        # instead of a 1-row MXU matmul -> lane-dense (1, tile_n) output row.
        o_ref[...] = jnp.sum(wf_ref[...] * h, axis=0,
                             keepdims=True).astype(o_ref.dtype)

    return kernel


# --------------------- one-time parameter preparation ------------------------
def prepare_params(params, one_tweak):
    """Fold the reshape(..., k, TT) @ one_tweak contraction into the weights.

    Done ONCE (not per forward call).  Returns effective weights for the
    clauses-on-lanes kernel:
       w0_eff  (C, F)  bf16,  b0_eff  (C, 1) f32
       mid_eff tuple of ((C, C) bf16, (C, 1) f32)
       wf_col  (C, 1)  f32   (used on the VPU path, so kept f32)
    """
    (w0, b0), mids, w_key = params
    tt = one_tweak.shape[0]

    def fold_w(w):                      # (TT*C, in) -> (C, in)
        c = w.shape[0] // tt
        return jnp.einsum("cti,t->ci", w.reshape(c, tt, w.shape[1]), one_tweak)

    def fold_b(b):                      # (TT*C,) -> (C, 1)
        c = b.shape[0] // tt
        return (b.reshape(c, tt) @ one_tweak).reshape(c, 1)

    w0_eff = fold_w(w0).astype(jnp.bfloat16)
    b0_eff = fold_b(b0).astype(jnp.float32)
    mid_eff = tuple((fold_w(wm).astype(jnp.bfloat16),
                     fold_b(bm).astype(jnp.float32)) for (wm, bm) in mids)
    wf_col = (one_tweak @ w_key).reshape(-1, 1).astype(jnp.float32)  # (C, 1)
    return (w0_eff, b0_eff, mid_eff, wf_col)


# ------------------------------- forward wrapper -----------------------------
def tweaked_clause_evaluator(x, prepared, *, tile_n=None):
    """x: (N, F) float32; prepared: output of prepare_params.  Returns (N,)."""
    n, f = x.shape
    assert f == F
    w0_eff, b0_eff, mid_eff, wf_col = prepared
    c = w0_eff.shape[0]
    n_mid = len(mid_eff)

    if tile_n is None:
        tile_n = _pick_tile_n(n)
    grid_n = pl.cdiv(n, tile_n)          # no host pad: Pallas masks the tail

    full = lambda i: (0, 0)
    in_specs = [pl.BlockSpec((tile_n, f), lambda i: (i, 0)),   # x tile
                pl.BlockSpec((c, f), full),                    # w0_eff
                pl.BlockSpec((c, 1), full)]                    # b0_eff
    args = [x, w0_eff, b0_eff]
    for (wm, bm) in mid_eff:
        in_specs += [pl.BlockSpec((c, c), full),               # w_mid_eff
                     pl.BlockSpec((c, 1), full)]               # b_mid_eff
        args += [wm, bm]
    in_specs.append(pl.BlockSpec((c, 1), full))                # wf_col
    args.append(wf_col)

    flops = 2 * n * (f * c + n_mid * c * c + c)
    bytes_accessed = (n * f * 4 + n * 4
                      + w0_eff.size * 2 + b0_eff.size * 4
                      + sum(wm.size * 2 + bm.size * 4 for wm, bm in mid_eff)
                      + wf_col.size * 4)

    out = pl.pallas_call(
        make_kernel(n_mid),
        out_shape=jax.ShapeDtypeStruct((1, n), jnp.float32),
        grid_spec=pltpu.PrefetchScalarGridSpec(
            num_scalar_prefetch=0,
            grid=(grid_n,),
            in_specs=in_specs,
            out_specs=pl.BlockSpec((1, tile_n), lambda i: (0, i)),
        ),
        compiler_params=pltpu.CompilerParams(
            dimension_semantics=("parallel",)),
        cost_estimate=pl.CostEstimate(flops=flops, transcendentals=0,
                                      bytes_accessed=bytes_accessed),
    )(*args)

    return out[0]


# ------------------------- pure-JAX reference (torch semantics) --------------
def reference_forward(x, params, one_tweak):
    (w0, b0), mids, w_key = params
    layers = [(w0, b0)] + list(mids) + [(w_key, None)]
    h = x
    for i, (w, b) in enumerate(layers):
        y = h @ w.T
        if b is not None:
            y = y + b
        k = y.shape[-1] // TT
        y = y.reshape(y.shape[:-1] + (k, TT))
        h = jnp.matmul(y, one_tweak)
        if i < len(layers) - 1:
            h = jnp.maximum(h, 0.0)
        else:
            h = jnp.squeeze(h, axis=-1)
    return h


# --------------------------------- main ---------------------------------------
def init_linear(key, out_f, in_f, bias=True):
    """Deterministic PyTorch-style uniform(-1/sqrt(fan_in), 1/sqrt(fan_in))."""
    k_w, k_b = jax.random.split(key)
    bound = 1.0 / (in_f ** 0.5)
    w = jax.random.uniform(k_w, (out_f, in_f), jnp.float32, -bound, bound)
    b = (jax.random.uniform(k_b, (out_f,), jnp.float32, -bound, bound)
         if bias else None)
    return w, b


if __name__ == "__main__":
    key = jax.random.PRNGKey(0)
    keys = jax.random.split(key, 3 + EMBEDDER_LAYERS + 1)

    w0, b0 = init_linear(keys[1], TT * C, F)
    mids = []
    for m in range(N_MID):
        wm, bm = init_linear(keys[2 + m], TT * C, C)
        mids.append((wm, bm))
    w_key, _ = init_linear(keys[2 + N_MID], TT, C, bias=False)
    params = ((w0, b0), tuple(mids), w_key)

    # setTweak([0.5, -0.25, 0.125]) -> one_tweak = [1.0, 0.5, -0.25, 0.125]
    one_tweak = jnp.array([1.0, 0.5, -0.25, 0.125], jnp.float32)

    # One-time prep (hoisted out of the per-call path; weights cast to bf16).
    prepared = jax.block_until_ready(prepare_params(params, one_tweak))

    forward = jax.jit(functools.partial(tweaked_clause_evaluator))

    # Primary check: N divisible by the tile.
    x = jax.random.normal(keys[0], (N, F), jnp.float32)
    out = jax.block_until_ready(forward(x, prepared))
    ref = reference_forward(x, params, one_tweak)
    assert out.shape == (N,)
    assert jnp.allclose(out, ref, atol=5e-2, rtol=5e-2), (
        f"max abs err {jnp.max(jnp.abs(out - ref))}")

    # Secondary check: ragged N exercising the pad-free partial last block.
    n2 = 200
    x2 = jax.random.normal(keys[3 + N_MID], (n2, F), jnp.float32)
    out2 = jax.block_until_ready(forward(x2, prepared))
    ref2 = reference_forward(x2, params, one_tweak)
    assert out2.shape == (n2,)
    assert jnp.allclose(out2, ref2, atol=5e-2, rtol=5e-2), (
        f"max abs err {jnp.max(jnp.abs(out2 - ref2))}")

    print("KERNEL_OK")
</pallas_src>

<mosaic_0001>
module attributes {stable_mosaic.version = 11 : i64} {
  func.func @kernel(%arg0: i32, %arg1: memref<128x8xf32, #tpu.memory_space<vmem>>, %arg2: memref<32x8xbf16, #tpu.memory_space<vmem>>, %arg3: memref<32x1xf32, #tpu.memory_space<vmem>>, %arg4: memref<32x32xbf16, #tpu.memory_space<vmem>>, %arg5: memref<32x1xf32, #tpu.memory_space<vmem>>, %arg6: memref<32x1xf32, #tpu.memory_space<vmem>>, %arg7: memref<1x128xf32, #tpu.memory_space<vmem>>) attributes {dimension_semantics = [#tpu.dimension_semantics<parallel>], iteration_bounds = array<i64: 2>, scalar_prefetch = 0 : i64, scratch_operands = 0 : i64, tpu.core_type = #tpu.core_type<tc>, window_params = [{transform_indices = @transform_0, window_bounds = array<i64: 128, 8>}, {pipeline_mode = #tpu.pipeline_mode<synchronous>, transform_indices = @transform_1, window_bounds = array<i64: 32, 8>}, {pipeline_mode = #tpu.pipeline_mode<synchronous>, transform_indices = @transform_2, window_bounds = array<i64: 32, 1>}, {pipeline_mode = #tpu.pipeline_mode<synchronous>, transform_indices = @transform_3, window_bounds = array<i64: 32, 32>}, {pipeline_mode = #tpu.pipeline_mode<synchronous>, transform_indices = @transform_4, window_bounds = array<i64: 32, 1>}, {pipeline_mode = #tpu.pipeline_mode<synchronous>, transform_indices = @transform_5, window_bounds = array<i64: 32, 1>}, {transform_indices = @transform_6, window_bounds = array<i64: 1, 128>}]} {
    %c0 = arith.constant 0 : index
    %c0_0 = arith.constant 0 : index
    %0 = vector.load %arg1[%c0, %c0_0] : memref<128x8xf32, #tpu.memory_space<vmem>>, vector<128x8xf32>
    %1 = arith.truncf %0 : vector<128x8xf32> to vector<128x8xbf16>
    %c0_1 = arith.constant 0 : index
    %c0_2 = arith.constant 0 : index
    %2 = vector.load %arg2[%c0_1, %c0_2] : memref<32x8xbf16, #tpu.memory_space<vmem>>, vector<32x8xbf16>
    %cst = arith.constant dense<0.000000e+00> : vector<32x128xf32>
    %3 = tpu.matmul %2, %1, %cst {dimension_numbers = #tpu.dot_dimension_numbers<[1], [1], [0], [0], [0, 0, 1, 0], [], []>} : vector<32x8xbf16>, vector<128x8xbf16>, vector<32x128xf32> -> vector<32x128xf32>
    %c0_3 = arith.constant 0 : index
    %c0_4 = arith.constant 0 : index
    %4 = vector.load %arg3[%c0_3, %c0_4] : memref<32x1xf32, #tpu.memory_space<vmem>>, vector<32x1xf32>
    %5 = vector.broadcast %4 : vector<32x1xf32> to vector<32x128xf32>
    %6 = arith.addf %3, %5 : vector<32x128xf32>
    %cst_5 = arith.constant 0.000000e+00 : f32
    %7 = vector.broadcast %cst_5 : f32 to vector<32x128xf32>
    %8 = arith.maximumf %6, %7 : vector<32x128xf32>
    %c0_6 = arith.constant 0 : index
    %c0_7 = arith.constant 0 : index
    %9 = vector.load %arg4[%c0_6, %c0_7] : memref<32x32xbf16, #tpu.memory_space<vmem>>, vector<32x32xbf16>
    %c0_8 = arith.constant 0 : index
    %c0_9 = arith.constant 0 : index
    %10 = vector.load %arg5[%c0_8, %c0_9] : memref<32x1xf32, #tpu.memory_space<vmem>>, vector<32x1xf32>
    %11 = arith.truncf %8 : vector<32x128xf32> to vector<32x128xbf16>
    %cst_10 = arith.constant dense<0.000000e+00> : vector<32x128xf32>
    %12 = tpu.matmul %9, %11, %cst_10 {dimension_numbers = #tpu.dot_dimension_numbers<[1], [0], [0], [1], [0, 0, 1, 1], [], []>} : vector<32x32xbf16>, vector<32x128xbf16>, vector<32x128xf32> -> vector<32x128xf32>
    %13 = vector.broadcast %10 : vector<32x1xf32> to vector<32x128xf32>
    %14 = arith.addf %12, %13 : vector<32x128xf32>
    %cst_11 = arith.constant 0.000000e+00 : f32
    %15 = vector.broadcast %cst_11 : f32 to vector<32x128xf32>
    %16 = arith.maximumf %14, %15 : vector<32x128xf32>
    %c0_12 = arith.constant 0 : index
    %c0_13 = arith.constant 0 : index
    %17 = vector.load %arg6[%c0_12, %c0_13] : memref<32x1xf32, #tpu.memory_space<vmem>>, vector<32x1xf32>
    %18 = vector.broadcast %17 : vector<32x1xf32> to vector<32x128xf32>
    %19 = arith.mulf %18, %16 : vector<32x128xf32>
    %cst_14 = arith.constant dense<0.000000e+00> : vector<128xf32>
    %20 = vector.multi_reduction <add>, %19, %cst_14 [0] : vector<32x128xf32> to vector<128xf32>
    %21 = vector.shape_cast %20 : vector<128xf32> to vector<1x128xf32>
    %c0_15 = arith.constant 0 : index
    %c0_16 = arith.constant 0 : index
    %22 = vector.load %arg7[%c0_15, %c0_16] : memref<1x128xf32, #tpu.memory_space<vmem>>, vector<1x128xf32>
    tpu.vector_store %arg7[%c0_15, %c0_16], %21 {strides = array<i32>} : memref<1x128xf32, #tpu.memory_space<vmem>>, vector<1x128xf32>,
    return
  }
  func.func @transform_0(%arg0: i32) -> (i32, i32) {
    %c0_i32 = arith.constant 0 : i32
    %c0_i32_0 = arith.constant 0 : i32
    return %arg0, %c0_i32 : i32, i32
  }
  func.func @transform_1(%arg0: i32) -> (i32, i32) {
    %c0_i32 = arith.constant 0 : i32
    %c0_i32_0 = arith.constant 0 : i32
    %c0_i32_1 = arith.constant 0 : i32
    return %c0_i32, %c0_i32_0 : i32, i32
  }
  func.func @transform_2(%arg0: i32) -> (i32, i32) {
    %c0_i32 = arith.constant 0 : i32
    %c0_i32_0 = arith.constant 0 : i32
    %c0_i32_1 = arith.constant 0 : i32
    return %c0_i32, %c0_i32_0 : i32, i32
  }
  func.func @transform_3(%arg0: i32) -> (i32, i32) {
    %c0_i32 = arith.constant 0 : i32
    %c0_i32_0 = arith.constant 0 : i32
    %c0_i32_1 = arith.constant 0 : i32
    return %c0_i32, %c0_i32_0 : i32, i32
  }
  func.func @transform_4(%arg0: i32) -> (i32, i32) {
    %c0_i32 = arith.constant 0 : i32
    %c0_i32_0 = arith.constant 0 : i32
    %c0_i32_1 = arith.constant 0 : i32
    return %c0_i32, %c0_i32_0 : i32, i32
  }
  func.func @transform_5(%arg0: i32) -> (i32, i32) {
    %c0_i32 = arith.constant 0 : i32
    %c0_i32_0 = arith.constant 0 : i32
    %c0_i32_1 = arith.constant 0 : i32
    return %c0_i32, %c0_i32_0 : i32, i32
  }
  func.func @transform_6(%arg0: i32) -> (i32, i32) {
    %c0_i32 = arith.constant 0 : i32
    %c0_i32_0 = arith.constant 0 : i32
    return %c0_i32, %arg0 : i32, i32
  }
}

</mosaic_0001>

<bundles_post_ra>
// kernel: tweaked_clause_evaluator.1
= control target key start
LH: loop header
LB: loop body
LE: loop exit
PB: predicated region body
PF: predicated region fallthrough
CT: control target
= control target key end

     0   :  { %11 = vsyncpa [#allocation3], 0  ;;  %s1003_s0 = inlined_call_operand.vmem [shape: f32[256,8], index: 0, kind: input, shape index: {}]   ;;  %s1004_s1 = inlined_call_operand.vmem [shape: bf16[32,8], index: 1, kind: input, shape index: {}]   ;;  %s1005_s2 = inlined_call_operand.vmem [shape: f32[32,1], index: 2, kind: input, shape index: {}]   ;;  %s1006_s3 = inlined_call_operand.vmem [shape: bf16[32,32], index: 3, kind: input, shape index: {}]   ;;  %s1007_s4 = inlined_call_operand.vmem [shape: f32[32,1], index: 4, kind: input, shape index: {}]   ;;  %s1008_s5 = inlined_call_operand.vmem [shape: f32[32,1], index: 5, kind: input, shape index: {}]   ;;  %s1009_s6 = inlined_call_operand.hbm [shape: f32[1,256], index: 6, kind: output, shape index: {}]  }
   0x1   :  { %13 = vsyncpa [#allocation3 + $0x1], 0  ;;  %s818_s21 = smov 0   ;;  %s820_s22 = smov 0  }
   0x2   :  { %s822_s23 = smov 0   ;;  %s824_s24 = smov 0  }
   0x3 LB: > { %s603_s25 = sadd.s32 4294967295, %s779_s24   ;;  %s604_s26 = sadd.s32 4294967294, %s779_s24   ;;  %s779_s24 = sphi %s824_s24, %s1015_s24   ;;  %s775_s23 = sphi %s822_s23, %s1014_s23   ;;  %s771_s22 = sphi %s820_s22, %s1013_s22   ;;  %s767_s21 = sphi %s818_s21, %s1012_s21  }
   0x4   : > { %s841_s27 = sadd.s32 1, %s779_s24   ;;  %s157_s28 = sadd.s32 1, %s775_s23 }
   0x5   : > { %s154_s29 = ssub.s32 %s779_s24, %s841_s27  ;;  %p167_p0 = scmp.ne.s32.totalorder %s775_s23, %s771_s22 }
   0x6   : > { %p155_p1 = scmp.eq.s32.totalorder %s154_s29, 0  ;;  %p168_p2 = scmp.eq.s32.totalorder %s603_s25, 1 }
   0x7   : > { %p173_p3 = scmp.ne.s32.totalorder %s771_s22, %s767_s21  ;;  %p174_p4 = scmp.eq.s32.totalorder %s604_s26, 1 }
   0x8   : > { %s851_s30 = scalar_select %p155_p1, %s775_s23, %s157_s28  }
   0x9   : > { %p853_p5 = por %p168_p2, %p167_p0  ;;  %p857_p6 = por %p174_p4, %p173_p3 }
   0xa   : > { %p607_p7 = scmp.ge.s32.totalorder %s779_s24, 1  ;;  %p216_p8 = scmp.lt.s32.totalorder %s779_s24, 3 }
   0xc   : > { %p217_p9 = pnand %p607_p7, %p216_p8 }
   0xd   : > { %s863_s9 = sshll.u32 (!%p217_p9), %s603_s25, 4  ;;  %v713_v0 = vld [vmem:[%s1004_s1] sm:$0xff] (!%p217_p9)   ;;  %vm314_vm0 = vcmask (!%p217_p9), 64512   ;;  %v282_v2 = vld [vmem:[%s1005_s2 + $0x10] sm:$0xff] (!%p217_p9)  ;;  %v781_v3 = vmov (!%p217_p9), 0   ;;  %v281_v4 = vld [vmem:[%s1005_s2 + $0x8] sm:$0xff] (!%p217_p9) }
   0xe   : > { %220 = sbr.rel (%p217_p9) target bundleno = 574 (0x23e), region = 44  ;;  %p246_p10 = scmp.lt.s32.totalorder (!%p217_p9), %s863_s9, 31  ;;  %v280_v1 = vld [vmem:[%s1005_s2] sm:$0xff] (!%p217_p9)  ;;  %651 = vmatprep.mubr.msk.bf16.mxu0 (!%p217_p9), %vm314_vm0, %v713_v0  ;;  %711 = vset.pattern.permute.xlu0 (!%p217_p9), %v781_v3  ;;  %v283_v5 = vld [vmem:[%s1005_s2 + $0x18] sm:$0xff] (!%p217_p9)  ;;  %v403_v14 = vld [vmem:[%s1007_s4 + $0x8] sm:$0xff] (!%p217_p9)  ;;  %vm438_vm1 = vcmask (!%p217_p9), 261120  }
   0xf   : > { %286 = vperm.xlu0 (!%p217_p9), %711, %v280_v1   ;;  %712 = vset.pattern.permute.xlu1 (!%p217_p9), %v781_v3  ;;  %v402_v12 = vld [vmem:[%s1007_s4] sm:$0xff] (!%p217_p9)  ;;  %v404_v17 = vld [vmem:[%s1007_s4 + $0x10] sm:$0xff] (!%p217_p9)  ;;  %v405_v18 = vld [vmem:[%s1007_s4 + $0x18] sm:$0xff] (!%p217_p9)  ;;  %s961_s28 = scalar_lea.hbm (!%p217_p9), %s1009_s6, %s863_s9  ;;  %s782_s11 = smov (!%p217_p9), [#allocation2]  }
  0x10   : > { %296 = vperm.xlu1 (!%p217_p9), %712, %v282_v2   ;;  %v498_v21 = vld [vmem:[%s1008_s5] sm:$0xff] (!%p217_p9)  ;;  %v499_v22 = vld [vmem:[%s1008_s5 + $0x8] sm:$0xff] (!%p217_p9)  ;;  %v500_v25 = vld [vmem:[%s1008_s5 + $0x10] sm:$0xff] (!%p217_p9)  ;;  %s721_s12 = sshll.u32 (!%p217_p9), %s782_s11, 4  ;;  %s722_s12 = int_to_ptr.vmem [resolvable:$false] %s721_s12 }
  0x11   : > { %v501_v26 = vld [vmem:[%s1008_s5 + $0x18] sm:$0xff] (!%p217_p9)  ;;  %v714_v46 = vld [vmem:[%s1004_s1 + $0x8] sm:$0xff] (!%p217_p9)   ;;  %v715_v47 = vld [vmem:[%s1006_s3] sm:$0xff] (!%p217_p9)   ;;  %s723_s13 = scalar_lea.vmem (!%p217_p9), %s722_s12, 32 }
  0x12   : > { %659 = vmatprep.mubr.msk.bf16.mxu1 (!%p217_p9), %vm438_vm1, %v715_v47  ;;  %v716_v2 = vld [vmem:[%s1006_s3 + $0x8] sm:$0xff] (!%p217_p9)  }
  0x13   : > { %291 = vperm.xlu0 (!%p217_p9), %711, %v281_v4  }
  0x14   : > { %301 = vperm.xlu1 (!%p217_p9), %712, %v283_v5  }
  0x15   : > { %s247_s16 = scalar_select %p246_p10, %s863_s9, 31 }
  0x17   : > { %s609_s17 = sshll.u32 %s247_s16, 3  ;;  %410 = vperm.xlu0 %711, %v402_v12  }
  0x18   : > { %s883_s26 = scalar_lea.vmem %s1003_s0, %s609_s17  ;;  %415 = vperm.xlu1 %712, %v403_v14   ;;  %s243_s17 = sand.u32 1, %s771_s22  }
  0x19   : > { %v252_v6 = vld [vmem:[%s883_s26] sm:$0xff]  ;;  %v253_v7 = vld [vmem:[%s883_s26 + $0x8] sm:$0xff]  ;;  %v254_v8 = vld [vmem:[%s883_s26 + $0x10] sm:$0xff]  ;;  %s244_s18 = scalar_lea.vmem [#allocation2], %s243_s17  ;;  %s537_s29 = scalar_lea.sflag [#allocation3], %s243_s17 }
  0x1a   : > { %v268_v9 = vpack.c.bf16 %v253_v7, %v252_v6  ;;  %v255_v10 = vld [vmem:[%s883_s26 + $0x18] sm:$0xff]  ;;  %v256_v15 = vld [vmem:[%s883_s26 + $0x20] sm:$0xff]  ;;  %v257_v16 = vld [vmem:[%s883_s26 + $0x28] sm:$0xff]  ;;  %s549_s19 = sshll.u32 %s244_s18, 4  ;;  %s963_s19 = int_to_ptr.vmem [resolvable:$true] %s549_s19 }
  0x1b   : > { %v269_v11 = vpack.c.bf16 %v255_v10, %v254_v8  ;;  %v270_v20 = vpack.c.bf16 %v257_v16, %v256_v15  ;;  %420 = vperm.xlu0 %711, %v404_v17   ;;  %v258_v23 = vld [vmem:[%s883_s26 + $0x30] sm:$0xff]  ;;  %v259_v24 = vld [vmem:[%s883_s26 + $0x38] sm:$0xff]  ;;  %v260_v29 = vld [vmem:[%s883_s26 + $0x40] sm:$0xff]  ;;  %s717_s10 = scalar_lea.vmem %s963_s19, 16  ;;  %p724_p0 = scmp.lt.s32.totalorder %s963_s19, %s722_s12 }
  0x1c   : > { %663 = vmatprep.subr.msk.bf16.mxu0 %vm314_vm0, %v268_v9  ;;  %v322_v13 = vsel %vm314_vm0, %v268_v9, 0  ;;  %425 = vperm.xlu1 %712, %v405_v18   ;;  %v271_v28 = vpack.c.bf16 %v259_v24, %v258_v23  ;;  %v261_v30 = vld [vmem:[%s883_s26 + $0x48] sm:$0xff]  ;;  %v262_v33 = vld [vmem:[%s883_s26 + $0x50] sm:$0xff]  ;;  %v263_v34 = vld [vmem:[%s883_s26 + $0x58] sm:$0xff]  ;;  %p718_p11 = scmp.ne.s32.totalorder %s963_s19, %s717_s10  ;;  %p725_p1 = scmp.lt.s32.totalorder %s723_s13, %s717_s10 }
  0x1d   : > { %636 = vmatpush3.bf16.xpose.msra.mxu0 %v322_v13  ;;  %v325_v19 = vsel %vm314_vm0, %v269_v11, 0  ;;  %v328_v27 = vsel %vm314_vm0, %v270_v20, 0  ;;  %v272_v32 = vpack.c.bf16 %v261_v30, %v260_v29  ;;  %v273_v36 = vpack.c.bf16 %v263_v34, %v262_v33  ;;  %v264_v37 = vld [vmem:[%s883_s26 + $0x60] sm:$0xff]  ;;  %v265_v38 = vld [vmem:[%s883_s26 + $0x68] sm:$0xff]  ;;  %v266_v41 = vld [vmem:[%s883_s26 + $0x70] sm:$0xff] }
  0x1e   : > { %664 = vmatprep.subr.msk.bf16.mxu0 %vm314_vm0, %v269_v11  ;;  %v331_v31 = vsel %vm314_vm0, %v271_v28, 0  ;;  %v274_v40 = vpack.c.bf16 %v265_v38, %v264_v37  ;;  %v267_v42 = vld [vmem:[%s883_s26 + $0x78] sm:$0xff]  ;;  %p719_p12 = pnand %p718_p11, %p853_p5  ;;  %p726_p2 = por %p725_p1, %p724_p0 }
  0x1f   : > { %504 = vperm.xlu0 %711, %v498_v21   ;;  %v334_v35 = vsel %vm314_vm0, %v272_v32, 0  ;;  %v337_v39 = vsel %vm314_vm0, %v273_v36, 0  ;;  %v275_v44 = vpack.c.bf16 %v267_v42, %v266_v41 }
  0x20   : > { %509 = vperm.xlu1 %712, %v499_v22   ;;  %v340_v43 = vsel %vm314_vm0, %v274_v40, 0  ;;  %p720_p13 = pneg %p719_p12 }
  0x21   : > { %v343_v45 = vsel %vm314_vm0, %v275_v44, 0 }
  0x22   : > { %p727_p3 = pnand %p726_p2, %p720_p13 }
  0x23   : > { %514 = vperm.xlu0 %711, %v500_v25  }
  0x24   : > { %519 = vperm.xlu1 %712, %v501_v26  }
  0x25   : > { %638 = vmatpush3.bf16.xpose.msra.mxu0 %v325_v19 }
  0x26   : > { %665 = vmatprep.subr.msk.bf16.mxu0 %vm314_vm0, %v270_v20 }
  0x2d   : > { %640 = vmatpush3.bf16.xpose.msra.mxu0 %v328_v27 }
  0x2e   : > { %666 = vmatprep.subr.msk.bf16.mxu0 %vm314_vm0, %v271_v28 }
  0x35   : > { %642 = vmatpush3.bf16.xpose.msra.mxu0 %v331_v31 }
  0x36   : > { %667 = vmatprep.subr.msk.bf16.mxu0 %vm314_vm0, %v272_v32 }
  0x3d   : > { %644 = vmatpush3.bf16.xpose.msra.mxu0 %v334_v35 }
  0x3e   : > { %668 = vmatprep.subr.msk.bf16.mxu0 %vm314_vm0, %v273_v36 }
  0x45   : > { %646 = vmatpush3.bf16.xpose.msra.mxu0 %v337_v39 }
  0x46   : > { %669 = vmatprep.subr.msk.bf16.mxu0 %vm314_vm0, %v274_v40 }
  0x4d   : > { %648 = vmatpush3.bf16.xpose.msra.mxu0 %v340_v43 }
  0x4e   : > { %670 = vmatprep.subr.msk.bf16.mxu0 %vm314_vm0, %v275_v44 }
  0x55   : > { %650 = vmatpush3.bf16.xpose.msra.mxu0 %v343_v45 }
  0x5c   : > { %652 = vmatmul.mubr.msk.bf16.vlgmr.msra.gmra.mrb[0].mxu0 %vm314_vm0, %v714_v46 }
  0x8e   : > { %v287_v49 = vpop.permute.xlu0 %286 }
  0x8f   : > { %v297_v48 = vpop.permute.xlu1 %296 }
  0x92   : > { %v292_v56 = vpop.permute.xlu0 %291 }
  0x93   : > { %v302_v53 = vpop.permute.xlu1 %301 }
  0x96   : > { %v411_v3 = vpop.permute.xlu0 %410 }
  0x97   : > { %v416_v4 = vpop.permute.xlu1 %415 }
  0x9a   : > { %v421_v5 = vpop.permute.xlu0 %420 }
  0x9b   : > { %v426_v6 = vpop.permute.xlu1 %425 }
  0x9e   : > { %v505_v12 = vpop.permute.xlu0 %504 }
  0x9f   : > { %v510_v17 = vpop.permute.xlu1 %509 }
  0xa2   : > { %v515_v23 = vpop.permute.xlu0 %514 }
  0xa3   : > { %v520_v26 = vpop.permute.xlu1 %519 }
 0x12f   : > { %v653_v50 = vpop.f32.mrb[0].mxu0 }
 0x130   : > { %v388_v51 = vadd.f32 %v653_v50, %v297_v48  ;;  %v379_v52 = vpop.f32.mrb[1].mxu0 }
 0x131   : > { %v380_v54 = vadd.f32 %v379_v52, %v287_v49  ;;  %v654_v55 = vpop.f32.mrb[2].mxu0 }
 0x132   : > { %v391_v57 = vadd.f32 %v654_v55, %v302_v53  ;;  %v382_v58 = vpop.f32.mrb[3].mxu0  ;;  %v396_v60 = vmax.f32 %v388_v51, 0.0 }
 0x133   : > { %v383_v59 = vadd.f32 %v382_v58, %v292_v56  ;;  %v394_v62 = vmax.f32 %v380_v54, 0.0 }
 0x134   : > { %v397_v61 = vmax.f32 %v391_v57, 0.0 }
 0x135   : > { %v395_v63 = vmax.f32 %v383_v59, 0.0 }
 0x136   : > { %v407_v0 = vpack.c.bf16 %v397_v61, %v396_v60 }
 0x137   : > { %v406_v1 = vpack.c.bf16 %v395_v63, %v394_v62 }
 0x139   : > { %655 = vmatprep.subr.bf16.mxu1 %v406_v1 }
 0x13a   : > { %656 = vmatpush3.bf16.msra.mxu1 %v406_v1 }
 0x13b   : > { %657 = vmatprep.subr.bf16.mxu1 %v407_v0 }
 0x13e   : > { %658 = vmatpush3.bf16.msra.mxu1 %v407_v0 }
 0x141   : > { %660 = vmatmul.mubr.msk.bf16.vlgmr.msra.gmra.mrb[0].mxu1 %vm438_vm1, %v716_v2 }
 0x214   : > { %v661_v7 = vpop.f32.mrb[0].mxu1 }
 0x215   : > { %v479_v8 = vpop.f32.mrb[1].mxu1  ;;  %v488_v9 = vadd.f32 %v661_v7, %v421_v5 }
 0x216   : > { %v480_v10 = vadd.f32 %v479_v8, %v411_v3  ;;  %v662_v11 = vpop.f32.mrb[2].mxu1 }
 0x217   : > { %v482_v13 = vpop.f32.mrb[3].mxu1  ;;  %v491_v15 = vadd.f32 %v662_v11, %v426_v6  ;;  %v496_v18 = vmax.f32 %v488_v9, 0.0 }
 0x218   : > { %v494_v14 = vmax.f32 %v480_v10, 0.0  ;;  %v483_v16 = vadd.f32 %v482_v13, %v416_v4 }
 0x219   : > { %v497_v21 = vmax.f32 %v491_v15, 0.0  ;;  %v524_v24 = vmul.f32 %v515_v23, %v496_v18 }
 0x21a   : > { %v495_v19 = vmax.f32 %v483_v16, 0.0  ;;  %v522_v20 = vmul.f32 %v505_v12, %v494_v14 }
 0x21b   : > { %v525_v27 = vmul.f32 %v520_v26, %v497_v21 }
 0x21c   : > { %v523_v22 = vmul.f32 %v510_v17, %v495_v19 }
 0x21e   : > { %v526_v25 = vadd.f32 %v523_v22, %v522_v20 }
 0x220   : > { %v527_v28 = vadd.f32 %v526_v25, %v524_v24 }
 0x222   : > { %v528_v29 = vadd.f32 %v527_v28, %v525_v27 }
 0x224   : > { %v529_v30 = vrot.slane %v528_v29, 4 }
 0x226   : > { %v530_v31 = vadd.f32 %v529_v30, %v528_v29 }
 0x228   : > { %v531_v32 = vrot.slane %v530_v31, 2 }
 0x22a   : > { %v532_v33 = vadd.f32 %v531_v32, %v530_v31 }
 0x22c   : > { %v533_v34 = vrot.slane %v532_v33, 1 }
 0x22e   : > { %v534_v35 = vadd.f32 %v533_v34, %v532_v33 }
 0x230   : > { %535 = vst [vmem:[%s244_s18] sm:$0x1] %v534_v35 }
 0x231   : > { %730 = shalt.err (!%p727_p3)
}
 0x232   : > { %s731_s9 = scalar_lea.hbm %s961_s28, 16  ;;  %s735_s26 = scalar_lea.hbm %s1009_s6, 32 }
 0x233   : > { %p732_p4 = scmp.ne.s32.totalorder %s961_s28, %s731_s9  ;;  %p736_p9 = scmp.lt.u32.totalorder %s961_s28, %s1009_s6 }
 0x234   : > { %p737_p10 = scmp.lt.u32.totalorder %s735_s26, %s731_s9  ;;  %p739_p12 = scmp.lt.u32.totalorder %s731_s9, %s961_s28 }
 0x235   : > { %p733_p7 = pnand %p732_p4, %p853_p5 }
 0x236   : > { %p738_p11 = por %p737_p10, %p736_p9 }
 0x237   : > { %p734_p8 = pneg %p733_p7 }
 0x238   : > { %p740_p13 = por %p739_p12, %p738_p11 }
 0x23a   : > { %p741_p0 = pnand %p740_p13, %p734_p8 }
 0x23c   : > { %744 = shalt.err (!%p741_p0)
}
 0x23d   : > { %671 = dma.vmem_to_hbm [thread:$0]  (%p853_p5), %s963_s19, 16, %s961_s28, %s537_s29  }
 0x23e PF: > { %p677_p1 = scmp.ge.s32.totalorder %s779_s24, 2  ;;  %s561_s18 = sand.u32 1, %s767_s21  }
 0x23f   : > { %s562_s20 = scalar_lea.sflag [#allocation3], %s561_s18 }
 0x240   : > { %p674_p2 = pnand %p677_p1, %p857_p6 }
 0x242   : > { %762 = dma.done.wait (!%p674_p2), %s562_s20, 16  }
 0x243   : > { %764 = vsyncadd (!%p674_p2), %s562_s20, 4294967280  ;;  %p16_p3 = scmp.ge.s32.totalorder %s841_s27, 4   ;;  %s1012_s21 = smov %s771_s22 }
 0x244   : > { %s1013_s22 = smov %s775_s23  ;;  %s1014_s23 = smov %s851_s30 }
 0x245   : > { %s1015_s24 = smov %s841_s27  ;;  %18 = sbr.rel (!%p16_p3) target bundleno = 3 (0x3), region = 79 }
 0x24c   :  { %566 = vsyncpa [#allocation3], 1 }
 0x24d   :  { %568 = vsyncpa [#allocation3 + $0x1], 1 }

</bundles_post_ra>
